<compile_context>
chip_gen: v6e
topology: v6e:2x2x1
jax: 0.10.0
libtpu: 0.0.40
codegen_flags: <defaults>
</compile_context>

<pallas_src>
import functools

import jax
import jax.numpy as jnp
from jax import lax
from jax.experimental import pallas as pl
from jax.experimental.pallas import tpu as pltpu


# ------------------------------- GELU (exact-erf) -----------------------------
_SQRT_HALF = 0.7071067811865476


def _erf_poly(x):
    # Abramowitz & Stegun 7.1.26 rational approximation, |err| <= 1.5e-7.
    # Uses only mul/add/div/exp/where so it lowers on every TPU generation.
    ax = jnp.abs(x)
    t = 1.0 / (1.0 + 0.3275911 * ax)
    poly = ((((1.061405429 * t - 1.453152027) * t + 1.421413741) * t
             - 0.284496736) * t + 0.254829592) * t
    y = 1.0 - poly * jnp.exp(-ax * ax)
    return jnp.where(x >= 0.0, y, -y)


def _gelu(x):
    # exact erf-based GELU (matches torch.nn.GELU(approximate='none') to ~1e-6)
    return 0.5 * x * (1.0 + _erf_poly(x * _SQRT_HALF))


# --------------------------------- helpers ------------------------------------
def _round_up(x, m):
    return ((x + m - 1) // m) * m


def _row_align(dtype):
    # sublane packing: 8 rows for 4-byte, 16 for 2-byte, 32 for 1-byte dtypes
    return {4: 8, 2: 16, 1: 32}.get(jnp.dtype(dtype).itemsize, 8)


def _pick_row_tile(m, tm, align):
    """Tile size <= tm, multiple of `align`; prefer an exact divisor of m."""
    tm = min(tm, m)
    tm -= tm % align
    if tm <= 0:
        return m                      # m smaller than alignment: single block
    for cand in range(tm, align - 1, -align):
        if m % cand == 0:
            return cand
    return tm                         # no aligned divisor: caller pads M up


# ----------------- K1 / K3: 1x1 conv (+folded BN, +residual, +GELU) -----------
def _conv1x1_bn_gelu_kernel(x_ref, w_ref, b_ref, o_ref, *, compute_dtype):
    x = x_ref[...]
    if compute_dtype is not None:
        x = x.astype(compute_dtype)         # cast for the MXU, inside the kernel
    y = jnp.dot(x, w_ref[...], preferred_element_type=jnp.float32)
    y = y + b_ref[...]
    o_ref[...] = _gelu(y).astype(o_ref.dtype)


def _conv1x1_bn_add_gelu_kernel(x_ref, w_ref, b_ref, r_ref, o_ref, *,
                                compute_dtype):
    x = x_ref[...]
    if compute_dtype is not None:
        x = x.astype(compute_dtype)
    y = jnp.dot(x, w_ref[...], preferred_element_type=jnp.float32)
    # residual stays in its original (f32) dtype: it only joins the f32 epilogue
    y = y + b_ref[...] + r_ref[...].astype(jnp.float32)
    o_ref[...] = _gelu(y).astype(o_ref.dtype)


def conv1x1_bn_gelu(x2d, w, bias, *, tm=1024, compute_dtype=None,
                    out_dtype=None):
    M, Cin = x2d.shape
    Cout = w.shape[1]
    if out_dtype is None:
        out_dtype = x2d.dtype
    if compute_dtype is not None:
        w = w.astype(compute_dtype)         # weights: tiny, one-time cast
    align = _row_align(compute_dtype if compute_dtype is not None else x2d.dtype)
    tm = _pick_row_tile(M, tm, align)
    Mp = _round_up(M, tm)
    xin = x2d if Mp == M else jnp.pad(x2d, ((0, Mp - M), (0, 0)))

    out = pl.pallas_call(
        functools.partial(_conv1x1_bn_gelu_kernel, compute_dtype=compute_dtype),
        out_shape=jax.ShapeDtypeStruct((Mp, Cout), out_dtype),
        grid=(Mp // tm,),
        in_specs=[pl.BlockSpec((tm, Cin), lambda i: (i, 0)),
                  pl.BlockSpec((Cin, Cout), lambda i: (0, 0)),
                  pl.BlockSpec((1, Cout), lambda i: (0, 0))],
        out_specs=pl.BlockSpec((tm, Cout), lambda i: (i, 0)),
        compiler_params=pltpu.CompilerParams(
            dimension_semantics=("parallel",)),
    )(xin, w, bias)
    return out if Mp == M else out[:M]


def conv1x1_bn_add_gelu(x2d, w, bias, residual, *, tm=1024, compute_dtype=None,
                        out_dtype=None):
    M, Cin = x2d.shape
    Cout = w.shape[1]
    if out_dtype is None:
        out_dtype = residual.dtype
    if compute_dtype is not None:
        w = w.astype(compute_dtype)
    align = _row_align(compute_dtype if compute_dtype is not None else x2d.dtype)
    tm = _pick_row_tile(M, tm, align)
    Mp = _round_up(M, tm)
    if Mp != M:
        x2d = jnp.pad(x2d, ((0, Mp - M), (0, 0)))
        residual = jnp.pad(residual, ((0, Mp - M), (0, 0)))

    out = pl.pallas_call(
        functools.partial(_conv1x1_bn_add_gelu_kernel,
                          compute_dtype=compute_dtype),
        out_shape=jax.ShapeDtypeStruct((Mp, Cout), out_dtype),
        grid=(Mp // tm,),
        in_specs=[pl.BlockSpec((tm, Cin), lambda i: (i, 0)),
                  pl.BlockSpec((Cin, Cout), lambda i: (0, 0)),
                  pl.BlockSpec((1, Cout), lambda i: (0, 0)),
                  pl.BlockSpec((tm, Cout), lambda i: (i, 0))],
        out_specs=pl.BlockSpec((tm, Cout), lambda i: (i, 0)),
        compiler_params=pltpu.CompilerParams(
            dimension_semantics=("parallel",)),
    )(x2d, w, bias, residual)
    return out if Mp == M else out[:M]


# ----------------- K2: 3x3 "same" conv (stride 1) + BN + GELU -----------------
def _conv3x3_bn_gelu_kernel(x_ref, w_ref, b_ref, o_ref, xp_ref):
    _, H, W, C = x_ref.shape
    Wp = xp_ref.shape[1]                    # padded width, multiple of 8, >= W+2
    Cout3 = w_ref.shape[2]                  # 3 * Cout  (kw folded into N dim)
    Cout = Cout3 // 3
    zdt = xp_ref.dtype

    # Fused tf_pad(kernel=3, stride=1): zero only the 1-pixel border (and the
    # right alignment columns), then write the unpadded tile into the interior.
    # Re-zeroed every step so megacore sharding of the batch axis stays correct.
    xp_ref[pl.ds(0, 1), :, :] = jnp.zeros((1, Wp, C), zdt)
    xp_ref[pl.ds(H + 1, 1), :, :] = jnp.zeros((1, Wp, C), zdt)
    xp_ref[:, pl.ds(0, 1), :] = jnp.zeros((H + 2, 1, C), zdt)
    xp_ref[:, pl.ds(W + 1, Wp - (W + 1)), :] = jnp.zeros(
        (H + 2, Wp - (W + 1), C), zdt)
    xp_ref[pl.ds(1, H), pl.ds(1, W), :] = x_ref[0].astype(zdt)
    xp = xp_ref[...]                        # (H+2, Wp, C), compute dtype

    # 3x3 conv with kw folded into the matmul N dimension: one contiguous
    # H-slab per kh (full padded width -> good MXU M-fill), three matmuls into
    # a single (H*Wp, 3*Cout) f32 accumulator.
    acc = jnp.zeros((H * Wp, Cout3), jnp.float32)
    for kh in range(3):
        sf = xp[kh:kh + H].reshape(H * Wp, C)     # free view (Wp % 8 == 0)
        acc = acc + jnp.dot(sf, w_ref[kh], preferred_element_type=jnp.float32)

    # out[h, w, co] = sum_kw acc[h, w + kw, kw*Cout + co]
    accr = acc.reshape(H, Wp, Cout3)
    y = (accr[:, 0:W, 0:Cout]
         + accr[:, 1:W + 1, Cout:2 * Cout]
         + accr[:, 2:W + 2, 2 * Cout:3 * Cout])
    y = y + b_ref[...].reshape(1, 1, Cout)
    o_ref[...] = _gelu(y).reshape(1, H, W, Cout).astype(o_ref.dtype)


def _k2_vmem_limit(H, W, Wp, C, Cout, x_bytes, s_bytes, o_bytes):
    need = (2 * H * W * C * x_bytes             # double-buffered input block
            + 2 * H * W * Cout * o_bytes        # double-buffered output block
            + (H + 2) * Wp * C * s_bytes        # padded scratch slab
            + H * Wp * 3 * Cout * 4             # f32 accumulator
            + 3 * C * 3 * Cout * s_bytes)       # folded weights
    # 2x headroom for compiler scratch, clamped to a sane range.
    # TODO(synk): on v7x (64 MiB physical VMEM) large stages need row-strip
    #             tiling rather than a bigger limit.
    return int(min(max(2 * need, 32 * 1024 * 1024), 100 * 1024 * 1024))


def conv3x3_bn_gelu(x_nhwc, w_hwio, bias, *, compute_dtype=None, out_dtype=None):
    N, H, W, C = x_nhwc.shape
    Cout = w_hwio.shape[-1]
    if out_dtype is None:
        out_dtype = x_nhwc.dtype

    # Fold the kw axis into the matmul N dimension: (3,3,C,Cout) -> (3, C, 3*Cout)
    # column group kw occupies columns [kw*Cout : (kw+1)*Cout].
    w_fold = jnp.transpose(w_hwio, (0, 2, 1, 3)).reshape(3, C, 3 * Cout)
    scratch_dtype = compute_dtype if compute_dtype is not None else x_nhwc.dtype
    if compute_dtype is not None:
        w_fold = w_fold.astype(compute_dtype)

    Wp = _round_up(W + 2, 8)                    # 8-sublane-aligned padded width
    vmem_limit = _k2_vmem_limit(H, W, Wp, C, Cout,
                                jnp.dtype(x_nhwc.dtype).itemsize,
                                jnp.dtype(scratch_dtype).itemsize,
                                jnp.dtype(out_dtype).itemsize)

    return pl.pallas_call(
        _conv3x3_bn_gelu_kernel,
        out_shape=jax.ShapeDtypeStruct((N, H, W, Cout), out_dtype),
        grid=(N,),
        in_specs=[pl.BlockSpec((1, H, W, C), lambda n: (n, 0, 0, 0)),
                  pl.BlockSpec((3, C, 3 * Cout), lambda n: (0, 0, 0)),
                  pl.BlockSpec((1, Cout), lambda n: (0, 0))],
        out_specs=pl.BlockSpec((1, H, W, Cout), lambda n: (n, 0, 0, 0)),
        scratch_shapes=[pltpu.VMEM((H + 2, Wp, C), scratch_dtype)],
        compiler_params=pltpu.CompilerParams(
            dimension_semantics=("parallel",),
            vmem_limit_bytes=vmem_limit),
    )(x_nhwc, w_fold, bias)


# ---------------------------------- wrapper -----------------------------------
def bottleneck_forward(x_nchw, params, stride=1, *, tm=1024, compute_dtype=None):
    assert stride == 1, "only stride=1 (downsample=None) is supported"
    N, Cin, H, W = x_nchw.shape
    planes = params["w1"].shape[1]
    assert Cin == 4 * planes, "residual add requires inplanes == planes * expansion"

    # Fold eval-mode BN scales into the conv weights (epilogue becomes bias-only).
    w1 = params["w1"] * params["s1"]                               # (Cin, planes)
    w2 = params["w2"] * params["s2"].reshape(1, 1, 1, planes)      # (3,3,planes,planes)
    w3 = params["w3"] * params["s3"]                               # (planes, Cin)

    x = jnp.transpose(x_nchw, (0, 2, 3, 1))                        # NHWC
    x2d = x.reshape(N * H * W, Cin)

    # Intermediates stay in compute_dtype (when set) to halve HBM traffic of the
    # HBM-bound 1x1 passes; only the final block output returns to the input dtype.
    inter_dtype = compute_dtype if compute_dtype is not None else x.dtype

    # conv1 (1x1) + bn1 + gelu  (M-tiled)
    out = conv1x1_bn_gelu(x2d, w1, params["b1"], tm=tm,
                          compute_dtype=compute_dtype, out_dtype=inter_dtype)
    out = out.reshape(N, H, W, planes)

    # tf_pad(kernel=3, stride=1) fused in-kernel; conv2 + bn2 + gelu
    out = conv3x3_bn_gelu(out, w2, params["b2"],
                          compute_dtype=compute_dtype, out_dtype=inter_dtype)

    # conv3 (1x1) + bn3 + residual add + gelu  (M-tiled); residual kept f32
    out = conv1x1_bn_add_gelu(out.reshape(N * H * W, planes),
                              w3, params["b3"], x2d, tm=tm,
                              compute_dtype=compute_dtype, out_dtype=x.dtype)
    out = out.reshape(N, H, W, Cin)
    return jnp.transpose(out, (0, 3, 1, 2))                        # back to NCHW


# ----------------------------- pure-JAX reference -----------------------------
def reference_forward(x_nchw, params):
    x = jnp.transpose(x_nchw, (0, 2, 3, 1))

    def conv(v, w):
        return lax.conv_general_dilated(v, w, (1, 1), "VALID",
                                        dimension_numbers=("NHWC", "HWIO", "NHWC"))

    gelu = lambda v: 0.5 * v * (1.0 + lax.erf(v / jnp.sqrt(2.0)))
    out = gelu(conv(x, params["w1"][None, None]) * params["s1"] + params["b1"])
    out = jnp.pad(out, ((0, 0), (1, 1), (1, 1), (0, 0)))
    out = gelu(conv(out, params["w2"]) * params["s2"] + params["b2"])
    out = gelu(conv(out, params["w3"][None, None]) * params["s3"] + params["b3"] + x)
    return jnp.transpose(out, (0, 3, 1, 2))


# ------------------------------------ main -------------------------------------
if __name__ == "__main__":
    key = jax.random.PRNGKey(0)
    N, inplanes, H, W = 2, 16, 16, 16        # inplanes = planes * expansion
    planes = inplanes // 4

    keys = jax.random.split(key, 16)
    x = jax.random.normal(keys[0], (N, inplanes, H, W), jnp.float32)

    def bn_fold(kg, kb, km, kv, c, eps=1e-5):
        gamma = 1.0 + 0.1 * jax.random.normal(kg, (c,), jnp.float32)
        beta = 0.1 * jax.random.normal(kb, (c,), jnp.float32)
        mean = 0.1 * jax.random.normal(km, (c,), jnp.float32)
        var = jnp.abs(jax.random.normal(kv, (c,), jnp.float32)) + 0.5
        scale = gamma / jnp.sqrt(var + eps)
        bias = beta - mean * scale
        return scale[None, :], bias[None, :]

    params = {}
    params["w1"] = 0.2 * jax.random.normal(keys[1], (inplanes, planes), jnp.float32)
    params["s1"], params["b1"] = bn_fold(keys[2], keys[3], keys[4], keys[5], planes)
    params["w2"] = 0.2 * jax.random.normal(keys[6], (3, 3, planes, planes), jnp.float32)
    params["s2"], params["b2"] = bn_fold(keys[7], keys[8], keys[9], keys[10], planes)
    params["w3"] = 0.2 * jax.random.normal(keys[11], (planes, 4 * planes), jnp.float32)
    params["s3"], params["b3"] = bn_fold(keys[12], keys[13], keys[14], keys[15], 4 * planes)

    # tm=128 -> M=512 splits into 4 tiles, exercising the pipelined/tiled path.
    out = bottleneck_forward(x, params, stride=1, tm=128)
    jax.block_until_ready(out)

    ref = reference_forward(x, params)
    max_err = float(jnp.max(jnp.abs(out - ref)))
    assert jnp.allclose(out, ref, atol=1e-4, rtol=1e-4), f"max abs err = {max_err}"

    # Smoke-test the bf16 compute path (bf16 MXU operands + bf16 intermediates,
    # f32 accumulate/epilogue); correctness is carried by the f32 check above.
    out_bf16 = bottleneck_forward(x, params, stride=1, tm=128,
                                  compute_dtype=jnp.bfloat16)
    jax.block_until_ready(out_bf16)
    assert bool(jnp.all(jnp.isfinite(out_bf16)))

    print("KERNEL_OK")
</pallas_src>

<mosaic_0001>
module attributes {stable_mosaic.version = 11 : i64} {
  func.func @_conv1x1_bn_gelu_kernel(%arg0: i32, %arg1: memref<128x16xf32, #tpu.memory_space<vmem>>, %arg2: memref<16x4xf32, #tpu.memory_space<vmem>>, %arg3: memref<1x4xf32, #tpu.memory_space<vmem>>, %arg4: memref<128x4xf32, #tpu.memory_space<vmem>>) attributes {dimension_semantics = [#tpu.dimension_semantics<parallel>], iteration_bounds = array<i64: 4>, scalar_prefetch = 0 : i64, scratch_operands = 0 : i64, tpu.core_type = #tpu.core_type<tc>, window_params = [{transform_indices = @transform_0, window_bounds = array<i64: 128, 16>}, {pipeline_mode = #tpu.pipeline_mode<synchronous>, transform_indices = @transform_1, window_bounds = array<i64: 16, 4>}, {pipeline_mode = #tpu.pipeline_mode<synchronous>, transform_indices = @transform_2, window_bounds = array<i64: 1, 4>}, {transform_indices = @transform_3, window_bounds = array<i64: 128, 4>}]} {
    %c0 = arith.constant 0 : index
    %c0_0 = arith.constant 0 : index
    %0 = vector.load %arg1[%c0, %c0_0] : memref<128x16xf32, #tpu.memory_space<vmem>>, vector<128x16xf32>
    %c0_1 = arith.constant 0 : index
    %c0_2 = arith.constant 0 : index
    %1 = vector.load %arg2[%c0_1, %c0_2] : memref<16x4xf32, #tpu.memory_space<vmem>>, vector<16x4xf32>
    %cst = arith.constant dense<0.000000e+00> : vector<128x4xf32>
    %2 = tpu.matmul %0, %1, %cst {dimension_numbers = #tpu.dot_dimension_numbers<[1], [0], [0], [1], [0, 0, 1, 1], [], []>} : vector<128x16xf32>, vector<16x4xf32>, vector<128x4xf32> -> vector<128x4xf32>
    %c0_3 = arith.constant 0 : index
    %c0_4 = arith.constant 0 : index
    %3 = vector.load %arg3[%c0_3, %c0_4] : memref<1x4xf32, #tpu.memory_space<vmem>>, vector<1x4xf32>
    %4 = vector.broadcast %3 : vector<1x4xf32> to vector<128x4xf32>
    %5 = arith.addf %2, %4 : vector<128x4xf32>
    %cst_5 = arith.constant 5.000000e-01 : f32
    %6 = vector.broadcast %cst_5 : f32 to vector<128x4xf32>
    %7 = arith.mulf %6, %5 : vector<128x4xf32>
    %cst_6 = arith.constant 0.707106769 : f32
    %8 = vector.broadcast %cst_6 : f32 to vector<128x4xf32>
    %9 = arith.mulf %5, %8 : vector<128x4xf32>
    %10 = math.absf %9 : vector<128x4xf32>
    %cst_7 = arith.constant 0.327591091 : f32
    %11 = vector.broadcast %cst_7 : f32 to vector<128x4xf32>
    %12 = arith.mulf %11, %10 : vector<128x4xf32>
    %cst_8 = arith.constant 1.000000e+00 : f32
    %13 = vector.broadcast %cst_8 : f32 to vector<128x4xf32>
    %14 = arith.addf %13, %12 : vector<128x4xf32>
    %cst_9 = arith.constant 1.000000e+00 : f32
    %15 = vector.broadcast %cst_9 : f32 to vector<128x4xf32>
    %16 = arith.divf %15, %14 : vector<128x4xf32>
    %cst_10 = arith.constant 1.06140542 : f32
    %17 = vector.broadcast %cst_10 : f32 to vector<128x4xf32>
    %18 = arith.mulf %17, %16 : vector<128x4xf32>
    %cst_11 = arith.constant 1.45315206 : f32
    %19 = vector.broadcast %cst_11 : f32 to vector<128x4xf32>
    %20 = arith.subf %18, %19 : vector<128x4xf32>
    %21 = arith.mulf %20, %16 : vector<128x4xf32>
    %cst_12 = arith.constant 1.42141378 : f32
    %22 = vector.broadcast %cst_12 : f32 to vector<128x4xf32>
    %23 = arith.addf %21, %22 : vector<128x4xf32>
    %24 = arith.mulf %23, %16 : vector<128x4xf32>
    %cst_13 = arith.constant 0.284496725 : f32
    %25 = vector.broadcast %cst_13 : f32 to vector<128x4xf32>
    %26 = arith.subf %24, %25 : vector<128x4xf32>
    %27 = arith.mulf %26, %16 : vector<128x4xf32>
    %cst_14 = arith.constant 0.254829586 : f32
    %28 = vector.broadcast %cst_14 : f32 to vector<128x4xf32>
    %29 = arith.addf %27, %28 : vector<128x4xf32>
    %30 = arith.mulf %29, %16 : vector<128x4xf32>
    %cst_15 = arith.constant 0.000000e+00 : f32
    %31 = vector.broadcast %cst_15 : f32 to vector<128x4xf32>
    %32 = arith.subf %31, %10 : vector<128x4xf32>
    %33 = arith.mulf %32, %10 : vector<128x4xf32>
    %34 = math.exp %33 : vector<128x4xf32>
    %35 = arith.mulf %30, %34 : vector<128x4xf32>
    %cst_16 = arith.constant 1.000000e+00 : f32
    %36 = vector.broadcast %cst_16 : f32 to vector<128x4xf32>
    %37 = arith.subf %36, %35 : vector<128x4xf32>
    %cst_17 = arith.constant 0.000000e+00 : f32
    %38 = vector.broadcast %cst_17 : f32 to vector<128x4xf32>
    %39 = arith.cmpf oge, %9, %38 : vector<128x4xf32>
    %cst_18 = arith.constant 0.000000e+00 : f32
    %40 = vector.broadcast %cst_18 : f32 to vector<128x4xf32>
    %41 = arith.subf %40, %37 : vector<128x4xf32>
    %42 = arith.select %39, %37, %41 : vector<128x4xi1>, vector<128x4xf32>
    %cst_19 = arith.constant 1.000000e+00 : f32
    %43 = vector.broadcast %cst_19 : f32 to vector<128x4xf32>
    %44 = arith.addf %43, %42 : vector<128x4xf32>
    %45 = arith.mulf %7, %44 : vector<128x4xf32>
    %c0_20 = arith.constant 0 : index
    %c0_21 = arith.constant 0 : index
    %46 = vector.load %arg4[%c0_20, %c0_21] : memref<128x4xf32, #tpu.memory_space<vmem>>, vector<128x4xf32>
    tpu.vector_store %arg4[%c0_20, %c0_21], %45 {strides = array<i32>} : memref<128x4xf32, #tpu.memory_space<vmem>>, vector<128x4xf32>,
    return
  }
  func.func @transform_0(%arg0: i32) -> (i32, i32) {
    %c0_i32 = arith.constant 0 : i32
    %c0_i32_0 = arith.constant 0 : i32
    return %arg0, %c0_i32 : i32, i32
  }
  func.func @transform_1(%arg0: i32) -> (i32, i32) {
    %c0_i32 = arith.constant 0 : i32
    %c0_i32_0 = arith.constant 0 : i32
    %c0_i32_1 = arith.constant 0 : i32
    return %c0_i32, %c0_i32_0 : i32, i32
  }
  func.func @transform_2(%arg0: i32) -> (i32, i32) {
    %c0_i32 = arith.constant 0 : i32
    %c0_i32_0 = arith.constant 0 : i32
    %c0_i32_1 = arith.constant 0 : i32
    return %c0_i32, %c0_i32_0 : i32, i32
  }
  func.func @transform_3(%arg0: i32) -> (i32, i32) {
    %c0_i32 = arith.constant 0 : i32
    %c0_i32_0 = arith.constant 0 : i32
    return %arg0, %c0_i32 : i32, i32
  }
}

</mosaic_0001>

<bundles_post_ra>
// kernel: tpu_custom_call.1
= control target key start
LH: loop header
LB: loop body
LE: loop exit
PB: predicated region body
PF: predicated region fallthrough
CT: control target
= control target key end

     0   :  { %s1108_s12 = smov 0   ;;  %s1478_s0 = inlined_call_operand.vmem [shape: f32[512,16], index: 0, kind: input, shape index: {}]   ;;  %s1479_s1 = inlined_call_operand.vmem [shape: f32[16,4], index: 1, kind: input, shape index: {}]   ;;  %s1480_s2 = inlined_call_operand.vmem [shape: f32[1,4], index: 2, kind: input, shape index: {}]   ;;  %s1481_s3 = inlined_call_operand.vmem [shape: f32[512,4], index: 3, kind: output, shape index: {}]  }
   0x1 LB: > { %s898_s13 = sadd.s32 4294967295, %s1086_s12   ;;  %p902_p0 = scmp.ge.s32.totalorder %s1086_s12, 1  ;;  %s1086_s12 = sphi %s1108_s12, %s13_s12  }
   0x2   : > { %p138_p1 = scmp.lt.s32.totalorder %s1086_s12, 5 }
   0x4   : > { %p139_p2 = pnand %p902_p0, %p138_p1 }
   0x5   : > { %s903_s18 = sshll.u32 (!%p139_p2), %s898_s13, 4 }
   0x6   : > { %142 = sbr.rel (%p139_p2) target bundleno = 337 (0x151), region = 32  ;;  %p163_p3 = scmp.lt.s32.totalorder (!%p139_p2), %s903_s18, 63 }
   0xb   : > { %v191_v0 = vld [vmem:[%s1479_s1 + $0x8] sm:$0xff]  ;;  %v190_v1 = vld [vmem:[%s1479_s1] sm:$0xff]  ;;  %s1483_s18 = smov (!%p163_p3, %s903_s18), 63  ;;  %vm199_vm0 = vcmask 130048   ;;  %vm825_vm3 = vcmask 31744  }
   0xc   : > { %976 = vmatprep.subr.mxu0 %v191_v0  ;;  %1004 = vmatprep.subr.mxu1 %v191_v0  ;;  %s904_s19 = sshll.u32 %s1483_s18, 3  ;;  %v1149_v18 = vld [vmem:[%s1480_s2] ss:$0 sm:$0xff] }
   0xd   : > { %977 = vmatpush3.msra.mxu0 %v191_v0  ;;  %1006 = vmatpush3.msra.mxu1 %v191_v0  ;;  %s166_s22 = scalar_lea.vmem %s1478_s0, %s904_s19  ;;  %s1321_s27 = scalar_lea.vmem %s1481_s3, %s904_s19 }
   0xe   : > { %978 = vmatprep.subr.mxu0 %v190_v1  ;;  %1005 = vmatprep.subr.mxu1 %v190_v1  ;;  %v174_v2 = vld [vmem:[%s166_s22] sm:$0xff]  ;;  %v175_v4 = vld [vmem:[%s166_s22 + $0x8] sm:$0xff]  ;;  %v176_v6 = vld [vmem:[%s166_s22 + $0x10] sm:$0xff] }
   0xf   : > { %979 = vmatpush3.msra.mxu0 %v190_v1  ;;  %1007 = vmatpush3.msra.mxu1 %v190_v1  ;;  %v182_v3 = vld [vmem:[%s166_s22 + $0x40] sm:$0xff]  ;;  %v183_v5 = vld [vmem:[%s166_s22 + $0x48] sm:$0xff]  ;;  %v184_v7 = vld [vmem:[%s166_s22 + $0x50] sm:$0xff] }
  0x10   : > { %980 = vmatprep.mubr.msk.f32.mxu0 %vm199_vm0, %v174_v2  ;;  %992 = vmatprep.mubr.msk.f32.mxu1 %vm199_vm0, %v182_v3  ;;  %v177_v8 = vld [vmem:[%s166_s22 + $0x18] sm:$0xff]  ;;  %v178_v10 = vld [vmem:[%s166_s22 + $0x20] sm:$0xff]  ;;  %v179_v12 = vld [vmem:[%s166_s22 + $0x28] sm:$0xff] }
  0x11   : > { %981 = vmatmul.mubr.msk.f32.vlgmr.msra.gmra.mxu0 %vm199_vm0, %v175_v4  ;;  %993 = vmatmul.mubr.msk.f32.vlgmr.msra.gmra.mxu1 %vm199_vm0, %v183_v5  ;;  %v185_v9 = vld [vmem:[%s166_s22 + $0x58] sm:$0xff]  ;;  %v186_v11 = vld [vmem:[%s166_s22 + $0x60] sm:$0xff]  ;;  %v187_v13 = vld [vmem:[%s166_s22 + $0x68] sm:$0xff] }
  0x12   : > { %983 = vmatprep.mubr.msk.f32.mxu0 %vm199_vm0, %v176_v6  ;;  %995 = vmatprep.mubr.msk.f32.mxu1 %vm199_vm0, %v184_v7  ;;  %v180_v14 = vld [vmem:[%s166_s22 + $0x30] sm:$0xff]  ;;  %v181_v16 = vld [vmem:[%s166_s22 + $0x38] sm:$0xff] }
  0x13   : > { %v188_v15 = vld [vmem:[%s166_s22 + $0x70] sm:$0xff]  ;;  %v189_v17 = vld [vmem:[%s166_s22 + $0x78] sm:$0xff] }
  0x15   : > { %984 = vmatmul.mubr.msk.f32.gmra.mxu0 %vm199_vm0, %v177_v8  ;;  %996 = vmatmul.mubr.msk.f32.gmra.mxu1 %vm199_vm0, %v185_v9 }
  0x16   : > { %986 = vmatprep.mubr.msk.f32.mxu0 %vm199_vm0, %v178_v10  ;;  %998 = vmatprep.mubr.msk.f32.mxu1 %vm199_vm0, %v186_v11 }
  0x19   : > { %987 = vmatmul.mubr.msk.f32.gmra.mxu0 %vm199_vm0, %v179_v12  ;;  %999 = vmatmul.mubr.msk.f32.gmra.mxu1 %vm199_vm0, %v187_v13 }
  0x1a   : > { %989 = vmatprep.mubr.msk.f32.mxu0 %vm199_vm0, %v180_v14  ;;  %1001 = vmatprep.mubr.msk.f32.mxu1 %vm199_vm0, %v188_v15 }
  0x1d   : > { %990 = vmatmul.mubr.msk.f32.gmra.mxu0 %vm199_vm0, %v181_v16  ;;  %1002 = vmatmul.mubr.msk.f32.gmra.mxu1 %vm199_vm0, %v189_v17 }
  0xd1   : > { %v982_v19 = vpop.f32.mrf.mxu0  ;;  %v994_v20 = vpop.f32.mrf.mxu1 }
  0xd2   : > { %v320_v21 = vadd.f32 %v982_v19, %v1149_v18  ;;  %v360_v22 = vadd.f32 %v994_v20, %v1149_v18 }
  0xd3   : > { %v314_v23 = vpop.f32.mrf.mxu0  ;;  %v354_v24 = vpop.f32.mrf.mxu1 }
  0xd4   : > { %v1153_v25 = vmul.f32 0.70710677, %v320_v21  ;;  %v1155_v26 = vmul.f32 0.70710677, %v360_v22  ;;  %v1158_v27 = vadd.f32 %v1149_v18, %v314_v23  ;;  %v1161_v28 = vadd.f32 %v1149_v18, %v354_v24 }
  0xd5   : > { %v985_v37 = vpop.f32.mrf.mxu0  ;;  %v997_v49 = vpop.f32.mrf.mxu1  ;;  %v1186_v62 = vmul.f32 0.5, %v320_v21  ;;  %v1202_v14 = vmul.f32 0.5, %v360_v22 }
  0xd6   : > { %v426_v29 = vand.u32 2147483647, %v1153_v25  ;;  %v434_v30 = vand.u32 2147483647, %v1155_v26  ;;  %v1166_v31 = vmul.f32 0.70710677, %v1158_v27  ;;  %v1174_v48 = vadd.f32 %v985_v37, %v1149_v18 }
  0xd7   : > { %v1169_v32 = vmul.f32 0.70710677, %v1161_v28  ;;  %v324_v50 = vpop.f32.mrf.mxu0  ;;  %v1180_v57 = vadd.f32 %v997_v49, %v1149_v18  ;;  %v364_v61 = vpop.f32.mrf.mxu1  ;;  %vm746_vm1 = vcmp.ge.f32.partialorder %v1153_v25, 0.0  ;;  %vm754_vm2 = vcmp.ge.f32.partialorder %v1155_v26, 0.0 }
  0xd8   : > { %v442_v33 = vmul.f32 0.3275911, %v426_v29  ;;  %v650_v34 = vsub.f32 0.0, %v426_v29  ;;  %v450_v35 = vmul.f32 0.3275911, %v434_v30  ;;  %v658_v36 = vsub.f32 0.0, %v434_v30 }
  0xd9   : > { %v425_v38 = vand.u32 2147483647, %v1166_v31  ;;  %v433_v39 = vand.u32 2147483647, %v1169_v32  ;;  %v1177_v54 = vmul.f32 0.70710677, %v1174_v48  ;;  %v1183_v58 = vadd.f32 %v1149_v18, %v324_v50  ;;  %v988_v13 = vpop.f32.mrf.mxu0 }
  0xda   : > { %v458_v40 = vadd.f32 1.0, %v442_v33  ;;  %v666_v41 = vmul.f32 %v650_v34, %v426_v29  ;;  %v466_v42 = vadd.f32 1.0, %v450_v35  ;;  %v674_v47 = vmul.f32 %v658_v36, %v434_v30  ;;  %v1000_v35 = vpop.f32.mrf.mxu1 }
  0xdb   : > { %v441_v43 = vmul.f32 0.3275911, %v425_v38  ;;  %v649_v44 = vsub.f32 0.0, %v425_v38  ;;  %v449_v45 = vmul.f32 0.3275911, %v433_v39  ;;  %v657_v46 = vsub.f32 0.0, %v433_v39  ;;  %v334_v50 = vpop.f32.mrf.mxu0 }
  0xdc   : > { %1016 = vrcp.f32 %v458_v40  ;;  %v683_v55 = vmul.f32 1.442695, %v666_v41  ;;  %v699_v59 = vmul.f32 1.442695, %v674_v47  ;;  %v428_v60 = vand.u32 2147483647, %v1177_v54 }
  0xdd   : > { %1018 = vrcp.f32 %v466_v42  ;;  %v457_v51 = vadd.f32 1.0, %v441_v43  ;;  %v665_v52 = vmul.f32 %v649_v44, %v425_v38  ;;  %v465_v53 = vadd.f32 1.0, %v449_v45 }
  0xde   : > { %v673_v56 = vmul.f32 %v657_v46, %v433_v39  ;;  %v1189_v0 = vmul.f32 0.70710677, %v1180_v57  ;;  %v444_v1 = vmul.f32 0.3275911, %v428_v60  ;;  %v652_v2 = vsub.f32 0.0, %v428_v60 }
  0xdf   : > { %1020 = vrcp.f32 %v457_v51  ;;  %v681_v63 = vmul.f32 1.442695, %v665_v52  ;;  %v1192_v3 = vmul.f32 0.70710677, %v1183_v58  ;;  %v1196_v6 = vadd.f32 %v1149_v18, %v364_v61 }
  0xe0   : > { %1022 = vrcp.f32 %v465_v53  ;;  %v697_v4 = vmul.f32 1.442695, %v673_v56  ;;  %v436_v5 = vand.u32 2147483647, %v1189_v0  ;;  %v460_v7 = vadd.f32 1.0, %v444_v1 }
  0xe1   : > { %1024 = vpow2.f32 %v683_v55  ;;  %v668_v8 = vmul.f32 %v652_v2, %v428_v60  ;;  %v427_v9 = vand.u32 2147483647, %v1192_v3  ;;  %v1200_v12 = vmul.f32 0.70710677, %v1196_v6 }
  0xe2   : > { %1026 = vpow2.f32 %v699_v59  ;;  %v452_v10 = vmul.f32 0.3275911, %v436_v5  ;;  %v660_v11 = vsub.f32 0.0, %v436_v5  ;;  %v1206_v29 = vadd.f32 %v988_v13, %v1149_v18 }
  0xe3   : > { %1028 = vpow2.f32 %v681_v63  ;;  %v443_v15 = vmul.f32 0.3275911, %v427_v9  ;;  %v651_v16 = vsub.f32 0.0, %v427_v9  ;;  %v435_v20 = vand.u32 2147483647, %v1200_v12 }
  0xe4   : > { %1030 = vrcp.f32 %v460_v7  ;;  %v468_v17 = vadd.f32 1.0, %v452_v10  ;;  %v676_v19 = vmul.f32 %v660_v11, %v436_v5  ;;  %v687_v21 = vmul.f32 1.442695, %v668_v8 }
  0xe5   : > { %1032 = vpow2.f32 %v697_v4  ;;  %v459_v23 = vadd.f32 1.0, %v443_v15  ;;  %v667_v24 = vmul.f32 %v651_v16, %v427_v9  ;;  %v1211_v33 = vmul.f32 0.5, %v1158_v27  ;;  %v374_v4 = vpop.f32.mrf.mxu1 }
  0xe6   : > { %1034 = vrcp.f32 %v468_v17  ;;  %v451_v22 = vmul.f32 0.3275911, %v435_v20  ;;  %v659_v34 = vsub.f32 0.0, %v435_v20  ;;  %v1217_v38 = vmul.f32 0.5, %v1161_v28 }
  0xe7   : > { %v703_v39 = vmul.f32 1.442695, %v676_v19  ;;  %1036 = vrcp.f32 %v459_v23  ;;  %v685_v41 = vmul.f32 1.442695, %v667_v24  ;;  %v1221_v44 = vmul.f32 0.70710677, %v1206_v29 }
  0xe8   : > { %v467_v42 = vadd.f32 1.0, %v451_v22  ;;  %v675_v43 = vmul.f32 %v659_v34, %v435_v20  ;;  %1038 = vpow2.f32 %v687_v21  ;;  %v1224_v45 = vadd.f32 %v1000_v35, %v1149_v18 }
  0xe9   : > { %v1208_v30 = vpop.eup %1016  ;;  %v1229_v28 = vmul.f32 0.5, %v1174_v48  ;;  %v430_v53 = vand.u32 2147483647, %v1221_v44  ;;  %v1238_v59 = vmul.f32 0.5, %v1180_v57  ;;  %v1245_v2 = vadd.f32 %v1149_v18, %v334_v50 }
  0xea   : > { %v1213_v36 = vpop.eup %1018  ;;  %v506_v37 = vmul.f32 1.0614054, %v1208_v30  ;;  %1040 = vrcp.f32 %v467_v42  ;;  %v701_v49 = vmul.f32 1.442695, %v675_v43  ;;  %v1241_v48 = vmul.f32 0.70710677, %v1224_v45 }
  0xeb   : > { %v514_v40 = vmul.f32 1.0614054, %v1213_v36  ;;  %1042 = vpow2.f32 %v703_v39  ;;  %v446_v8 = vmul.f32 0.3275911, %v430_v53  ;;  %v654_v9 = vsub.f32 0.0, %v430_v53 }
  0xec   : > { %v925_v27 = vadd.f32 -1.4531521, %v506_v37  ;;  %v1226_v46 = vpop.eup %1020  ;;  %1044 = vpow2.f32 %v685_v41  ;;  %v1252_v15 = vand.u32 2147483647, %v1241_v48  ;;  %v1258_v21 = vadd.f32 %v1149_v18, %v374_v4 }
  0xed   : > { %v933_v47 = vadd.f32 -1.4531521, %v514_v40  ;;  %v505_v52 = vmul.f32 1.0614054, %v1226_v46  ;;  %v1234_v55 = vpop.eup %1022  ;;  %1046 = vpow2.f32 %v701_v49  ;;  %v462_v19 = vadd.f32 1.0, %v446_v8 }
  0xee   : > { %v538_v51 = vmul.f32 %v1208_v30, %v925_v27  ;;  %v1025_v60 = vpop.eup %1024  ;;  %v513_v1 = vmul.f32 1.0614054, %v1234_v55  ;;  %v670_v20 = vmul.f32 %v654_v9, %v430_v53  ;;  %v454_v40 = vmul.f32 0.3275911, %v1252_v15 }
  0xef   : > { %v546_v56 = vmul.f32 %v1213_v36, %v933_v47  ;;  %v924_v63 = vadd.f32 -1.4531521, %v505_v52  ;;  %v1027_v5 = vpop.eup %1026  ;;  %1048 = vrcp.f32 %v462_v19  ;;  %vm745_vm4 = vcmp.ge.f32.partialorder %v1166_v31, 0.0 }
  0xf0   : > { %v554_v61 = vadd.f32 1.4214138, %v538_v51  ;;  %v1247_v57 = vpop.eup %1028  ;;  %v932_v13 = vadd.f32 -1.4531521, %v513_v1  ;;  %v691_v39 = vmul.f32 1.442695, %v670_v20 }
  0xf1   : > { %v562_v7 = vadd.f32 1.4214138, %v546_v56  ;;  %v537_v11 = vmul.f32 %v1226_v46, %v924_v63  ;;  %v1254_v16 = vpop.eup %1030  ;;  %v470_v52 = vadd.f32 1.0, %v454_v40  ;;  %vm753_vm5 = vcmp.ge.f32.partialorder %v1169_v32, 0.0 }
  0xf2   : > { %v570_v10 = vmul.f32 %v1208_v30, %v554_v61  ;;  %v1260_v23 = vpop.eup %1032  ;;  %v545_v34 = vmul.f32 %v1234_v55, %v932_v13  ;;  %v508_v35 = vmul.f32 1.0614054, %v1254_v16  ;;  %1050 = vpow2.f32 %v691_v39 }
  0xf3   : > { %v578_v17 = vmul.f32 %v1213_v36, %v562_v7  ;;  %v553_v22 = vadd.f32 1.4214138, %v537_v11  ;;  %v1265_v41 = vpop.eup %1034  ;;  %1052 = vrcp.f32 %v470_v52  ;;  %vm748_vm6 = vcmp.ge.f32.partialorder %v1177_v54, 0.0 }
  0xf4   : > { %v941_v24 = vadd.f32 -0.28449672, %v570_v10  ;;  %v561_v27 = vadd.f32 1.4214138, %v545_v34  ;;  %v927_v47 = vadd.f32 -1.4531521, %v508_v35  ;;  %v1269_v49 = vpop.eup %1036 }
  0xf5   : > { %v949_v37 = vadd.f32 -0.28449672, %v578_v17  ;;  %v569_v43 = vmul.f32 %v1226_v46, %v553_v22  ;;  %v516_v51 = vmul.f32 1.0614054, %v1265_v41  ;;  %v1275_v1 = vpop.eup %1038  ;;  %v507_v8 = vmul.f32 1.0614054, %v1269_v49 }
  0xf6   : > { %v602_v42 = vmul.f32 %v1208_v30, %v941_v24  ;;  %v577_v61 = vmul.f32 %v1234_v55, %v561_v27  ;;  %v540_v63 = vmul.f32 %v1254_v16, %v927_v47  ;;  %vm756_vm7 = vcmp.ge.f32.partialorder %v1189_v0, 0.0 }
  0xf7   : > { %v610_v50 = vmul.f32 %v1213_v36, %v949_v37  ;;  %v940_v56 = vadd.f32 -0.28449672, %v569_v43  ;;  %v935_v7 = vadd.f32 -1.4531521, %v516_v51  ;;  %v1279_v9 = vpop.eup %1040  ;;  %v926_v22 = vadd.f32 -1.4531521, %v507_v8 }
  0xf8   : > { %v618_v53 = vadd.f32 0.2548296, %v602_v42  ;;  %v948_v13 = vadd.f32 -0.28449672, %v577_v61  ;;  %v556_v17 = vadd.f32 1.4214138, %v540_v63  ;;  %v1284_v19 = vpop.eup %1042 }
  0xf9   : > { %v626_v4 = vadd.f32 0.2548296, %v610_v50  ;;  %v601_v11 = vmul.f32 %v1226_v46, %v940_v56  ;;  %v548_v24 = vmul.f32 %v1265_v41, %v935_v7  ;;  %v515_v34 = vmul.f32 1.0614054, %v1279_v9  ;;  %v1289_v35 = vpop.eup %1044 }
  0xfa   : > { %v634_v10 = vmul.f32 %v1208_v30, %v618_v53  ;;  %v609_v39 = vmul.f32 %v1234_v55, %v948_v13  ;;  %v572_v40 = vmul.f32 %v1254_v16, %v556_v17  ;;  %v1295_v47 = vpop.eup %1046  ;;  %vm747_vm8 = vcmp.ge.f32.partialorder %v1192_v3, 0.0 }
  0xfb   : > { %v642_v20 = vmul.f32 %v1213_v36, %v626_v4  ;;  %v617_v30 = vadd.f32 0.2548296, %v601_v11  ;;  %v564_v43 = vadd.f32 1.4214138, %v548_v24  ;;  %v539_v36 = vmul.f32 %v1269_v49, %v926_v22 }
  0xfc   : > { %v714_v37 = vmul.f32 %v1025_v60, %v634_v10  ;;  %v934_v27 = vadd.f32 -1.4531521, %v515_v34  ;;  %v625_v52 = vadd.f32 0.2548296, %v609_v39  ;;  %v943_v60 = vadd.f32 -0.28449672, %v572_v40  ;;  %v1305_v17 = vpop.eup %1048 }
  0xfd   : > { %v722_v42 = vmul.f32 %v1027_v5, %v642_v20  ;;  %v633_v51 = vmul.f32 %v1226_v46, %v617_v30  ;;  %v580_v56 = vmul.f32 %v1265_v41, %v564_v43  ;;  %v555_v61 = vadd.f32 1.4214138, %v539_v36 }
  0xfe   : > { %v730_v50 = vsub.f32 1.0, %v714_v37  ;;  %v547_v5 = vmul.f32 %v1279_v9, %v934_v27  ;;  %v641_v7 = vmul.f32 %v1234_v55, %v625_v52  ;;  %v604_v8 = vmul.f32 %v1254_v16, %v943_v60 }
  0xff   : > { %v738_v53 = vsub.f32 1.0, %v722_v42  ;;  %v713_v4 = vmul.f32 %v1247_v57, %v633_v51  ;;  %v951_v46 = vadd.f32 -0.28449672, %v580_v56  ;;  %v571_v11 = vmul.f32 %v1269_v49, %v555_v61  ;;  %v1314_v39 = vpop.eup %1050 }
 0x100   : > { %v762_v63 = vsub.f32 0.0, %v730_v50  ;;  %v563_v13 = vadd.f32 1.4214138, %v547_v5  ;;  %v721_v22 = vmul.f32 %v1260_v23, %v641_v7  ;;  %v620_v34 = vadd.f32 0.2548296, %v604_v8 }
 0x101   : > { %v770_v10 = vsub.f32 0.0, %v738_v53  ;;  %v729_v24 = vsub.f32 1.0, %v713_v4  ;;  %v612_v37 = vmul.f32 %v1265_v41, %v951_v46  ;;  %v942_v30 = vadd.f32 -0.28449672, %v571_v11 }
 0x102   : > { %v778_v20 = vsel %vm746_vm1, %v730_v50, %v762_v63  ;;  %v737_v40 = vsub.f32 1.0, %v721_v22  ;;  %v636_v26 = vmul.f32 %v1254_v16, %v620_v34  ;;  %v579_v27 = vmul.f32 %v1279_v9, %v563_v13  ;;  %v1327_v50 = vpop.eup %1052 }
 0x103   : > { %v794_v57 = vadd.f32 1.0, %v778_v20  ;;  %v786_v55 = vsel %vm754_vm2, %v738_v53, %v770_v10  ;;  %v761_v23 = vsub.f32 0.0, %v729_v24  ;;  %v628_v43 = vadd.f32 0.2548296, %v612_v37 }
 0x104   : > { %v802_v25 = vadd.f32 1.0, %v786_v55  ;;  %v603_v36 = vmul.f32 %v1269_v49, %v942_v30  ;;  %v769_v60 = vsub.f32 0.0, %v737_v40  ;;  %v716_v53 = vmul.f32 %v1275_v1, %v636_v26 }
 0x105   : > { %v810_v42 = vmul.f32 %v794_v57, %v1186_v62  ;;  %v777_v52 = vsel %vm745_vm4, %v729_v24, %v761_v23  ;;  %v644_v16 = vmul.f32 %v1265_v41, %v628_v43  ;;  %v950_v61 = vadd.f32 -0.28449672, %v579_v27 }
 0x106   : > { %v818_v51 = vmul.f32 %v802_v25, %v1202_v14  ;;  %v793_v62 = vadd.f32 1.0, %v777_v52  ;;  %v619_v56 = vadd.f32 0.2548296, %v603_v36  ;;  %v785_v14 = vsel %vm753_vm5, %v737_v40, %v769_v60  ;;  %v991_v60 = vpop.f32.mrf.mxu0 }
 0x107   : > { %827 = vst.msk [vmem:[%s1321_s27 + $0x8] sm:$0xff] %vm825_vm3, %v810_v42  ;;  %v732_v31 = vsub.f32 1.0, %v716_v53  ;;  %v510_v1 = vmul.f32 1.0614054, %v1305_v17  ;;  %v518_v5 = vmul.f32 1.0614054, %v1327_v50  ;;  %v724_v41 = vmul.f32 %v1284_v19, %v644_v16 }
 0x108   : > { %835 = vst.msk [vmem:[%s1321_s27 + $0x48] sm:$0xff] %vm825_vm3, %v818_v51  ;;  %v809_v63 = vmul.f32 %v793_v62, %v1211_v33  ;;  %v801_v4 = vadd.f32 1.0, %v785_v14  ;;  %v635_v7 = vmul.f32 %v1269_v49, %v619_v56  ;;  %v611_v10 = vmul.f32 %v1279_v9, %v950_v61 }
 0x109   : > { %v764_v8 = vsub.f32 0.0, %v732_v31  ;;  %v929_v32 = vadd.f32 -1.4531521, %v510_v1  ;;  %v937_v46 = vadd.f32 -1.4531521, %v518_v5  ;;  %v740_v13 = vsub.f32 1.0, %v724_v41 }
 0x10a   : > { %826 = vst.msk [vmem:[%s1321_s27] sm:$0xff] %vm825_vm3, %v809_v63  ;;  %v817_v11 = vmul.f32 %v801_v4, %v1217_v38  ;;  %v715_v20 = vmul.f32 %v1289_v35, %v635_v7  ;;  %v662_v33 = vsub.f32 0.0, %v1252_v15  ;;  %v627_v19 = vadd.f32 0.2548296, %v611_v10  ;;  %v1003_v7 = vpop.f32.mrf.mxu1  ;;  %v344_v10 = vpop.f32.mrf.mxu0 }
 0x10b   : > { %v780_v24 = vsel %vm748_vm6, %v732_v31, %v764_v8  ;;  %v542_v49 = vmul.f32 %v1305_v17, %v929_v32  ;;  %v550_v22 = vmul.f32 %v1327_v50, %v937_v46  ;;  %v772_v57 = vsub.f32 0.0, %v740_v13 }
 0x10c   : > { %834 = vst.msk [vmem:[%s1321_s27 + $0x40] sm:$0xff] %vm825_vm3, %v817_v11  ;;  %v796_v34 = vadd.f32 1.0, %v780_v24  ;;  %v731_v55 = vsub.f32 1.0, %v715_v20  ;;  %v678_v38 = vmul.f32 %v662_v33, %v1252_v15  ;;  %v643_v35 = vmul.f32 %v1279_v9, %v627_v19  ;;  %v384_v19 = vpop.f32.mrf.mxu1 }
 0x10d   : > { %v558_v37 = vadd.f32 1.4214138, %v542_v49  ;;  %v566_v30 = vadd.f32 1.4214138, %v550_v22  ;;  %v1362_v54 = vmul.f32 0.70710677, %v1245_v2  ;;  %v788_v23 = vsel %vm756_vm7, %v740_v13, %v772_v57 }
 0x10e   : > { %v812_v25 = vmul.f32 %v796_v34, %v1229_v28  ;;  %v763_v40 = vsub.f32 0.0, %v731_v55  ;;  %v707_v26 = vmul.f32 1.442695, %v678_v38  ;;  %v804_v42 = vadd.f32 1.0, %v788_v23 }
 0x10f   : > { %v723_v43 = vmul.f32 %v1295_v47, %v643_v35  ;;  %v574_v15 = vmul.f32 %v1305_v17, %v558_v37  ;;  %v582_v9 = vmul.f32 %v1327_v50, %v566_v30  ;;  %v395_v36 = vmul.f32 0.5, %v1183_v58 }
 0x110   : > { %829 = vst.msk [vmem:[%s1321_s27 + $0x18] sm:$0xff] %vm825_vm3, %v812_v25  ;;  %v779_v28 = vsel %vm747_vm8, %v731_v55, %v763_v40  ;;  %1054 = vpow2.f32 %v707_v26  ;;  %v429_v0 = vand.u32 2147483647, %v1362_v54  ;;  %v820_v27 = vmul.f32 %v804_v42, %v1238_v59 }
 0x111   : > { %v795_v51 = vadd.f32 1.0, %v779_v28  ;;  %v739_v52 = vsub.f32 1.0, %v723_v43  ;;  %v945_v47 = vadd.f32 -0.28449672, %v574_v15  ;;  %v953_v53 = vadd.f32 -0.28449672, %v582_v9 }
 0x112   : > { %v445_v62 = vmul.f32 0.3275911, %v429_v0  ;;  %837 = vst.msk [vmem:[%s1321_s27 + $0x58] sm:$0xff] %vm825_vm3, %v820_v27  ;;  %v1381_v3 = vmul.f32 0.70710677, %v1258_v21  ;;  %vm755_vm9 = vcmp.ge.f32.partialorder %v1200_v12, 0.0  ;;  %v1386_v14 = vadd.f32 %v991_v60, %v1149_v18 }
 0x113   : > { %v811_v16 = vmul.f32 %v795_v51, %v395_v36  ;;  %v771_v56 = vsub.f32 0.0, %v739_v52  ;;  %v606_v58 = vmul.f32 %v1305_v17, %v945_v47  ;;  %v614_v59 = vmul.f32 %v1327_v50, %v953_v53 }
 0x114   : > { %v461_v61 = vadd.f32 1.0, %v445_v62  ;;  %v437_v5 = vand.u32 2147483647, %v1381_v3  ;;  %v403_v63 = vmul.f32 0.5, %v1196_v6  ;;  %v1394_v46 = vmul.f32 0.70710677, %v1386_v14 }
 0x115   : > { %828 = vst.msk [vmem:[%s1321_s27 + $0x10] sm:$0xff] %vm825_vm3, %v811_v16  ;;  %v787_v31 = vsel %vm755_vm9, %v739_v52, %v771_v56  ;;  %v622_v1 = vadd.f32 0.2548296, %v606_v58  ;;  %v630_v41 = vadd.f32 0.2548296, %v614_v59  ;;  %v1398_v20 = vadd.f32 %v1003_v7, %v1149_v18 }
 0x116   : > { %v803_v4 = vadd.f32 1.0, %v787_v31  ;;  %1056 = vrcp.f32 %v461_v61  ;;  %v453_v8 = vmul.f32 0.3275911, %v437_v5  ;;  %v432_v33 = vand.u32 2147483647, %v1394_v46 }
 0x117   : > { %v638_v12 = vmul.f32 %v1305_v17, %v622_v1  ;;  %v646_v6 = vmul.f32 %v1327_v50, %v630_v41  ;;  %v1405_v17 = vadd.f32 %v1149_v18, %v344_v10  ;;  %v653_v49 = vsub.f32 0.0, %v429_v0 }
 0x118   : > { %v819_v32 = vmul.f32 %v803_v4, %v403_v63  ;;  %v469_v13 = vadd.f32 1.0, %v453_v8  ;;  %v448_v22 = vmul.f32 0.3275911, %v432_v33  ;;  %vm750_vm10 = vcmp.ge.f32.partialorder %v1221_v44, 0.0 }
 0x119   : > { %v718_v11 = vmul.f32 %v1314_v39, %v638_v12  ;;  %v1408_v39 = vmul.f32 0.70710677, %v1398_v20  ;;  %v1412_v55 = vmul.f32 0.70710677, %v1405_v17  ;;  %v1416_v37 = vadd.f32 %v1149_v18, %v384_v19 }
 0x11a   : > { %836 = vst.msk [vmem:[%s1321_s27 + $0x50] sm:$0xff] %vm825_vm3, %v819_v32  ;;  %1058 = vrcp.f32 %v469_v13  ;;  %v464_v38 = vadd.f32 1.0, %v448_v22  ;;  %v398_v30 = vmul.f32 0.5, %v1206_v29  ;;  %v669_v44 = vmul.f32 %v653_v49, %v429_v0 }
 0x11b   : > { %v734_v24 = vsub.f32 1.0, %v718_v11  ;;  %v440_v35 = vand.u32 2147483647, %v1408_v39  ;;  %v431_v23 = vand.u32 2147483647, %v1412_v55  ;;  %v661_v42 = vsub.f32 0.0, %v437_v5 }
 0x11c   : > { %1060 = vrcp.f32 %v464_v38  ;;  %v1421_v28 = vmul.f32 0.70710677, %v1416_v37  ;;  %vm758_vm11 = vcmp.ge.f32.partialorder %v1241_v48, 0.0  ;;  %v689_v0 = vmul.f32 1.442695, %v669_v44 }
 0x11d   : > { %v1055_v34 = vpop.eup %1054  ;;  %v766_v57 = vsub.f32 0.0, %v734_v24  ;;  %v456_v43 = vmul.f32 0.3275911, %v440_v35  ;;  %v447_v15 = vmul.f32 0.3275911, %v431_v23  ;;  %v406_v60 = vmul.f32 0.5, %v1224_v45 }
 0x11e   : > { %v726_v50 = vmul.f32 %v1055_v34, %v646_v6  ;;  %v439_v47 = vand.u32 2147483647, %v1421_v28  ;;  %v677_v62 = vmul.f32 %v661_v42, %v437_v5  ;;  %v656_v56 = vsub.f32 0.0, %v432_v33 }
 0x11f   : > { %v782_v25 = vsel %vm750_vm10, %v734_v24, %v766_v57  ;;  %v472_v29 = vadd.f32 1.0, %v456_v43  ;;  %v463_v27 = vadd.f32 1.0, %v447_v15  ;;  %v664_v7 = vsub.f32 0.0, %v440_v35 }
 0x120   : > { %v798_v40 = vadd.f32 1.0, %v782_v25  ;;  %v742_v26 = vsub.f32 1.0, %v726_v50  ;;  %v455_v58 = vmul.f32 0.3275911, %v439_v47  ;;  %v705_v63 = vmul.f32 1.442695, %v677_v62 }
 0x121   : > { %1062 = vrcp.f32 %v472_v29  ;;  %v672_v41 = vmul.f32 %v656_v56, %v432_v33  ;;  %v655_v5 = vsub.f32 0.0, %v431_v23  ;;  %v680_v6 = vmul.f32 %v664_v7, %v440_v35 }
 0x122   : > { %v814_v9 = vmul.f32 %v798_v40, %v398_v30  ;;  %v774_v36 = vsub.f32 0.0, %v742_v26  ;;  %1064 = vrcp.f32 %v463_v27  ;;  %v471_v31 = vadd.f32 1.0, %v455_v58 }
 0x123   : > { %v1057_v18 = vpop.eup %1056  ;;  %1066 = vpow2.f32 %v689_v0  ;;  %v695_v13 = vmul.f32 1.442695, %v672_v41  ;;  %v671_v19 = vmul.f32 %v655_v5, %v431_v23  ;;  %v663_v49 = vsub.f32 0.0, %v439_v47 }
 0x124   : > { %831 = vst.msk [vmem:[%s1321_s27 + $0x28] sm:$0xff] %vm825_vm3, %v814_v9  ;;  %v790_v51 = vsel %vm758_vm11, %v742_v26, %v774_v36  ;;  %v509_v52 = vmul.f32 1.0614054, %v1057_v18  ;;  %1068 = vrcp.f32 %v471_v31  ;;  %v711_v30 = vmul.f32 1.442695, %v680_v6 }
 0x125   : > { %v806_v53 = vadd.f32 1.0, %v790_v51  ;;  %1070 = vpow2.f32 %v705_v63  ;;  %v693_v44 = vmul.f32 1.442695, %v671_v19  ;;  %v679_v42 = vmul.f32 %v663_v49, %v439_v47 }
 0x126   : > { %v928_v16 = vadd.f32 -1.4531521, %v509_v52  ;;  %1072 = vpow2.f32 %v695_v13  ;;  %vm749_vm12 = vcmp.ge.f32.partialorder %v1362_v54, 0.0  ;;  %vm757_vm13 = vcmp.ge.f32.partialorder %v1381_v3, 0.0 }
 0x127   : > { %v822_v48 = vmul.f32 %v806_v53, %v406_v60  ;;  %v1059_v59 = vpop.eup %1058  ;;  %1074 = vpow2.f32 %v711_v30  ;;  %v709_v53 = vmul.f32 1.442695, %v679_v42  ;;  %vm752_vm14 = vcmp.ge.f32.partialorder %v1394_v46, 0.0 }
 0x128   : > { %v541_v61 = vmul.f32 %v1057_v18, %v928_v16  ;;  %v517_v1 = vmul.f32 1.0614054, %v1059_v59  ;;  %1076 = vpow2.f32 %v693_v44  ;;  %vm760_vm15 = vcmp.ge.f32.partialorder %v1408_v39, 0.0 }
 0x129   : > { %839 = vst.msk [vmem:[%s1321_s27 + $0x68] sm:$0xff] %vm825_vm3, %v822_v48  ;;  %v1061_v8 = vpop.eup %1060  ;;  %1078 = vpow2.f32 %v709_v53  ;;  %vm751_vm0 = vcmp.ge.f32.partialorder %v1412_v55, 0.0  ;;  %vm759_vm1 = vcmp.ge.f32.partialorder %v1421_v28, 0.0  ;;  %v407_v55 = vmul.f32 0.5, %v1416_v37 }
 0x12a   : > { %v557_v4 = vadd.f32 1.4214138, %v541_v61  ;;  %v936_v45 = vadd.f32 -1.4531521, %v517_v1  ;;  %v512_v11 = vmul.f32 1.0614054, %v1061_v8 }
 0x12c   : > { %v573_v12 = vmul.f32 %v1057_v18, %v557_v4  ;;  %v549_v10 = vmul.f32 %v1059_v59, %v936_v45  ;;  %v931_v34 = vadd.f32 -1.4531521, %v512_v11 }
 0x12e   : > { %v944_v32 = vadd.f32 -0.28449672, %v573_v12  ;;  %v565_v24 = vadd.f32 1.4214138, %v549_v10  ;;  %v1430_v50 = vpop.eup %1062  ;;  %v544_v38 = vmul.f32 %v1061_v8, %v931_v34 }
 0x12f   : > { %v1432_v25 = vpop.eup %1064  ;;  %v520_v26 = vmul.f32 1.0614054, %v1430_v50 }
 0x130   : > { %v605_v22 = vmul.f32 %v1057_v18, %v944_v32  ;;  %v581_v57 = vmul.f32 %v1059_v59, %v565_v24  ;;  %v560_v43 = vadd.f32 1.4214138, %v544_v38  ;;  %v511_v23 = vmul.f32 1.0614054, %v1432_v25  ;;  %v1067_v15 = vpop.eup %1066 }
 0x131   : > { %v939_v36 = vadd.f32 -1.4531521, %v520_v26  ;;  %v1436_v52 = vpop.eup %1068 }
 0x132   : > { %v621_v33 = vadd.f32 0.2548296, %v605_v22  ;;  %v952_v40 = vadd.f32 -0.28449672, %v581_v57  ;;  %v576_v27 = vmul.f32 %v1061_v8, %v560_v43  ;;  %v930_v51 = vadd.f32 -1.4531521, %v511_v23  ;;  %v1071_v48 = vpop.eup %1070 }
 0x133   : > { %v552_v60 = vmul.f32 %v1430_v50, %v939_v36  ;;  %v519_v16 = vmul.f32 1.0614054, %v1436_v52  ;;  %v1073_v54 = vpop.eup %1072 }
 0x134   : > { %v637_v35 = vmul.f32 %v1057_v18, %v621_v33  ;;  %v613_v9 = vmul.f32 %v1059_v59, %v952_v40  ;;  %v947_v47 = vadd.f32 -0.28449672, %v576_v27  ;;  %v543_v18 = vmul.f32 %v1432_v25, %v930_v51  ;;  %v1075_v42 = vpop.eup %1074 }
 0x135   : > { %v568_v58 = vadd.f32 1.4214138, %v552_v60  ;;  %v938_v63 = vadd.f32 -1.4531521, %v519_v16  ;;  %v1077_v3 = vpop.eup %1076  ;;  %v400_v51 = vmul.f32 0.5, %v1386_v14  ;;  %v408_v14 = vmul.f32 0.5, %v1398_v20 }
 0x136   : > { %v717_v29 = vmul.f32 %v1067_v15, %v637_v35  ;;  %v629_v0 = vadd.f32 0.2548296, %v613_v9  ;;  %v608_v31 = vmul.f32 %v1061_v8, %v947_v47  ;;  %v559_v1 = vadd.f32 1.4214138, %v543_v18  ;;  %v1079_v60 = vpop.eup %1078 }
 0x137   : > { %v584_v41 = vmul.f32 %v1430_v50, %v568_v58  ;;  %v551_v12 = vmul.f32 %v1436_v52, %v938_v63 }
 0x138   : > { %v733_v62 = vsub.f32 1.0, %v717_v29  ;;  %v645_v56 = vmul.f32 %v1059_v59, %v629_v0  ;;  %v624_v45 = vadd.f32 0.2548296, %v608_v31  ;;  %v575_v5 = vmul.f32 %v1432_v25, %v559_v1 }
 0x139   : > { %v397_v59 = vmul.f32 0.5, %v1245_v2  ;;  %v955_v11 = vadd.f32 -0.28449672, %v584_v41  ;;  %v567_v24 = vadd.f32 1.4214138, %v551_v12  ;;  %v405_v2 = vmul.f32 0.5, %v1258_v21 }
 0x13a   : > { %v765_v61 = vsub.f32 0.0, %v733_v62  ;;  %v725_v4 = vmul.f32 %v1071_v48, %v645_v56  ;;  %v640_v13 = vmul.f32 %v1061_v8, %v624_v45  ;;  %v946_v6 = vadd.f32 -0.28449672, %v575_v5 }
 0x13b   : > { %v616_v22 = vmul.f32 %v1430_v50, %v955_v11  ;;  %v583_v33 = vmul.f32 %v1436_v52, %v567_v24 }
 0x13c   : > { %v781_v7 = vsel %vm749_vm12, %v733_v62, %v765_v61  ;;  %v741_v32 = vsub.f32 1.0, %v725_v4  ;;  %v720_v34 = vmul.f32 %v1073_v54, %v640_v13  ;;  %v607_v57 = vmul.f32 %v1432_v25, %v946_v6 }
 0x13d   : > { %v797_v10 = vadd.f32 1.0, %v781_v7  ;;  %v632_v38 = vadd.f32 0.2548296, %v616_v22  ;;  %v954_v44 = vadd.f32 -0.28449672, %v583_v33 }
 0x13e   : > { %v773_v49 = vsub.f32 0.0, %v741_v32  ;;  %v736_v40 = vsub.f32 1.0, %v720_v34  ;;  %v623_v26 = vadd.f32 0.2548296, %v607_v57 }
 0x13f   : > { %v813_v19 = vmul.f32 %v797_v10, %v397_v59  ;;  %v648_v35 = vmul.f32 %v1430_v50, %v632_v38  ;;  %v615_v9 = vmul.f32 %v1436_v52, %v954_v44 }
 0x140   : > { %v789_v8 = vsel %vm757_vm13, %v741_v32, %v773_v49  ;;  %v768_v23 = vsub.f32 0.0, %v736_v40  ;;  %v639_v15 = vmul.f32 %v1432_v25, %v623_v26 }
 0x141   : > { %830 = vst.msk [vmem:[%s1321_s27 + $0x20] sm:$0xff] %vm825_vm3, %v813_v19  ;;  %v805_v30 = vadd.f32 1.0, %v789_v8  ;;  %v728_v21 = vmul.f32 %v1075_v42, %v648_v35  ;;  %v631_v27 = vadd.f32 0.2548296, %v615_v9 }
 0x142   : > { %v784_v36 = vsel %vm752_vm14, %v736_v40, %v768_v23  ;;  %v719_v29 = vmul.f32 %v1077_v3, %v639_v15 }
 0x143   : > { %v821_v43 = vmul.f32 %v805_v30, %v405_v2  ;;  %v800_v0 = vadd.f32 1.0, %v784_v36  ;;  %v744_v50 = vsub.f32 1.0, %v728_v21  ;;  %v647_v62 = vmul.f32 %v1436_v52, %v631_v27 }
 0x144   : > { %v735_v53 = vsub.f32 1.0, %v719_v29  ;;  %v399_v52 = vmul.f32 0.5, %v1405_v17 }
 0x145   : > { %838 = vst.msk [vmem:[%s1321_s27 + $0x60] sm:$0xff] %vm825_vm3, %v821_v43  ;;  %v816_v25 = vmul.f32 %v800_v0, %v400_v51  ;;  %v776_v47 = vsub.f32 0.0, %v744_v50  ;;  %v727_v18 = vmul.f32 %v1079_v60, %v647_v62 }
 0x146   : > { %v767_v46 = vsub.f32 0.0, %v735_v53 }
 0x147   : > { %833 = vst.msk [vmem:[%s1321_s27 + $0x38] sm:$0xff] %vm825_vm3, %v816_v25  ;;  %v792_v16 = vsel %vm760_vm15, %v744_v50, %v776_v47  ;;  %v743_v48 = vsub.f32 1.0, %v727_v18 }
 0x148   : > { %v808_v56 = vadd.f32 1.0, %v792_v16  ;;  %v783_v58 = vsel %vm751_vm0, %v735_v53, %v767_v46 }
 0x149   : > { %v799_v61 = vadd.f32 1.0, %v783_v58  ;;  %v775_v39 = vsub.f32 0.0, %v743_v48 }
 0x14a   : > { %v824_v31 = vmul.f32 %v808_v56, %v408_v14 }
 0x14b   : > { %v815_v1 = vmul.f32 %v799_v61, %v399_v52  ;;  %v791_v63 = vsel %vm759_vm1, %v743_v48, %v775_v39 }
 0x14c   : > { %841 = vst.msk [vmem:[%s1321_s27 + $0x78] sm:$0xff] %vm825_vm3, %v824_v31  ;;  %v807_v20 = vadd.f32 1.0, %v791_v63 }
 0x14d   : > { %832 = vst.msk [vmem:[%s1321_s27 + $0x30] sm:$0xff] %vm825_vm3, %v815_v1 }
 0x14e   : > { %v823_v4 = vmul.f32 %v807_v20, %v407_v55 }
 0x150   : > { %840 = vst.msk [vmem:[%s1321_s27 + $0x70] sm:$0xff] %vm825_vm3, %v823_v4 }
 0x151 PF: > { %s13_s12 = sadd.s32 1, %s1086_s12  }
 0x152   : > { %p10_p4 = scmp.ge.s32.totalorder %s13_s12, 6  }
 0x154   :  { %12 = sbr.rel (!%p10_p4) target bundleno = 1 (0x1), region = 62 }

</bundles_post_ra>
